<compile_context>
chip_gen: v7x
topology: tpu7x:2x2x1
jax: 0.10.0
libtpu: 0.0.40
codegen_flags: <defaults>
</compile_context>

<pallas_src>
import functools

import jax
import jax.numpy as jnp
from jax.experimental import pallas as pl
from jax.experimental.pallas import tpu as pltpu

EPS = 1e-5


# ----------------------------- kernels ------------------------------------ #

def linear_stats_kernel(b_valid, x_ref, w_ref, b_ref, z_ref, s_ref, ss_ref):
    """z = x @ W + b for one batch tile; accumulate masked sum / sum(z^2)."""
    i = pl.program_id(0)
    z = jnp.dot(x_ref[...].astype(jnp.bfloat16),
                w_ref[...].astype(jnp.bfloat16),
                preferred_element_type=jnp.float32) + b_ref[...]
    z_ref[...] = z

    tb, n = z.shape
    rows = i * tb + jax.lax.broadcasted_iota(jnp.int32, (tb, n), 0)
    zm = jnp.where(rows < b_valid, z, 0.0)          # exclude padded batch rows

    @pl.when(i == 0)
    def _():
        s_ref[...] = jnp.zeros_like(s_ref)
        ss_ref[...] = jnp.zeros_like(ss_ref)

    s_ref[...] += jnp.sum(zm, axis=0, keepdims=True)
    ss_ref[...] += jnp.sum(zm * zm, axis=0, keepdims=True)


def bn_relu_linear_stats_kernel(b_valid, z1_ref, s1_ref, ss1_ref, g1_ref,
                                bt1_ref, w_ref, b_ref,
                                z2_ref, s2_ref, ss2_ref):
    """Fused BN1 (folded scale/shift) + ReLU + Linear2 + stats of z2."""
    i = pl.program_id(0)
    inv_n = 1.0 / b_valid
    mean = s1_ref[...] * inv_n
    var = jnp.maximum(ss1_ref[...] * inv_n - mean * mean, 0.0)   # biased var
    scale = jax.lax.rsqrt(var + EPS) * g1_ref[...]               # EUP rsqrt
    shift = bt1_ref[...] - mean * scale

    h = jnp.maximum(z1_ref[...] * scale + shift, 0.0)            # BN1 + ReLU
    z2 = jnp.dot(h.astype(jnp.bfloat16),
                 w_ref[...].astype(jnp.bfloat16),
                 preferred_element_type=jnp.float32) + b_ref[...]
    z2_ref[...] = z2

    tb, n = z2.shape
    rows = i * tb + jax.lax.broadcasted_iota(jnp.int32, (tb, n), 0)
    zm = jnp.where(rows < b_valid, z2, 0.0)

    @pl.when(i == 0)
    def _():
        s2_ref[...] = jnp.zeros_like(s2_ref)
        ss2_ref[...] = jnp.zeros_like(ss2_ref)

    s2_ref[...] += jnp.sum(zm, axis=0, keepdims=True)
    ss2_ref[...] += jnp.sum(zm * zm, axis=0, keepdims=True)


def bn_kernel(b_valid, z_ref, s_ref, ss_ref, g_ref, bt_ref, out_ref):
    """Final BatchNorm (no ReLU), folded into one scale/shift per column."""
    inv_n = 1.0 / b_valid
    mean = s_ref[...] * inv_n
    var = jnp.maximum(ss_ref[...] * inv_n - mean * mean, 0.0)
    scale = jax.lax.rsqrt(var + EPS) * g_ref[...]
    shift = bt_ref[...] - mean * scale
    out_ref[...] = z_ref[...] * scale + shift


# ----------------------------- wrapper ------------------------------------ #

def _round_up(x, m):
    return (x + m - 1) // m * m


def _pad_to(a, shape):
    return jnp.pad(a, [(0, t - s) for s, t in zip(a.shape, shape)])


def simclr_forward(x, w1, b1, g1, bt1, w3, b3, g2, bt2, *, tb=None):
    """SimCLRModule forward: out = BN(Linear(relu(BN(Linear(x)))))."""
    B, F = x.shape
    H = w1.shape[1]
    O = w3.shape[1]
    Fp, Hp, Op = _round_up(F, 128), _round_up(H, 128), _round_up(O, 128)

    if tb is None:
        # >= 512 rows per tile for production batches (amortizes ~0.35us/step);
        # whole (sublane-rounded) batch when it is small.
        tb = min(_round_up(B, 8), 512)
    Bp = _round_up(B, tb)
    nb = Bp // tb

    f32 = jnp.float32
    xp = _pad_to(x.astype(f32), (Bp, Fp))
    w1p, b1p = _pad_to(w1, (Fp, Hp)), _pad_to(b1, (1, Hp))
    g1p, bt1p = _pad_to(g1, (1, Hp)), _pad_to(bt1, (1, Hp))
    w3p, b3p = _pad_to(w3, (Hp, Op)), _pad_to(b3, (1, Op))
    g2p, bt2p = _pad_to(g2, (1, Op)), _pad_to(bt2, (1, Op))

    vmem_cap = 32 * 1024 * 1024  # safe on v5e/v6e (128 MiB) and v7x (64 MiB)
    acc_params = pltpu.CompilerParams(dimension_semantics=("arbitrary",),
                                      vmem_limit_bytes=vmem_cap)
    par_params = pltpu.CompilerParams(dimension_semantics=("parallel",),
                                      vmem_limit_bytes=vmem_cap)

    row_spec = lambda c: pl.BlockSpec((tb, c), lambda i: (i, 0))
    col_spec = lambda c: pl.BlockSpec((1, c), lambda i: (0, 0))

    # ---- pass 1: Linear1 + batch statistics of z1 ----
    z1, s1, ss1 = pl.pallas_call(
        functools.partial(linear_stats_kernel, B),
        grid=(nb,),
        in_specs=[row_spec(Fp),
                  pl.BlockSpec((Fp, Hp), lambda i: (0, 0)),
                  col_spec(Hp)],
        out_specs=(row_spec(Hp), col_spec(Hp), col_spec(Hp)),
        out_shape=(jax.ShapeDtypeStruct((Bp, Hp), f32),
                   jax.ShapeDtypeStruct((1, Hp), f32),
                   jax.ShapeDtypeStruct((1, Hp), f32)),
        compiler_params=acc_params,
        cost_estimate=pl.CostEstimate(
            flops=2 * Bp * Fp * Hp + 4 * Bp * Hp,
            transcendentals=0,
            bytes_accessed=4 * (Bp * Fp + Fp * Hp + 2 * Bp * Hp)),
    )(xp, w1p, b1p)

    # ---- pass 2: BN1 (folded) + ReLU + Linear2 + batch statistics of z2 ----
    z2, s2, ss2 = pl.pallas_call(
        functools.partial(bn_relu_linear_stats_kernel, B),
        grid=(nb,),
        in_specs=[row_spec(Hp),
                  col_spec(Hp), col_spec(Hp), col_spec(Hp), col_spec(Hp),
                  pl.BlockSpec((Hp, Op), lambda i: (0, 0)),
                  col_spec(Op)],
        out_specs=(row_spec(Op), col_spec(Op), col_spec(Op)),
        out_shape=(jax.ShapeDtypeStruct((Bp, Op), f32),
                   jax.ShapeDtypeStruct((1, Op), f32),
                   jax.ShapeDtypeStruct((1, Op), f32)),
        compiler_params=acc_params,
        cost_estimate=pl.CostEstimate(
            flops=2 * Bp * Hp * Op + 6 * Bp * Hp + 4 * Bp * Op,
            transcendentals=nb * Hp,
            bytes_accessed=4 * (Bp * Hp + Hp * Op + 2 * Bp * Op)),
    )(z1, s1, ss1, g1p, bt1p, w3p, b3p)

    # ---- pass 3: BN2 (folded) normalize; "parallel" -> both v7x TCs ----
    out = pl.pallas_call(
        functools.partial(bn_kernel, B),
        grid=(nb,),
        in_specs=[row_spec(Op),
                  col_spec(Op), col_spec(Op), col_spec(Op), col_spec(Op)],
        out_specs=row_spec(Op),
        out_shape=jax.ShapeDtypeStruct((Bp, Op), f32),
        compiler_params=par_params,
        cost_estimate=pl.CostEstimate(
            flops=2 * Bp * Op,
            transcendentals=nb * Op,
            bytes_accessed=4 * 2 * Bp * Op),
    )(z2, s2, ss2, g2p, bt2p)

    return out[:B, :O]


# --------------------------- init & reference ------------------------------ #

def init_params(key, in_features, proj_dim, out_dim):
    """nn.Linear default init (uniform +-1/sqrt(fan_in)); BN gamma=1, beta=0."""
    k1, k2, k3, k4 = jax.random.split(key, 4)
    bd1 = 1.0 / (in_features ** 0.5)
    w1 = jax.random.uniform(k1, (in_features, proj_dim), jnp.float32, -bd1, bd1)
    b1 = jax.random.uniform(k2, (1, proj_dim), jnp.float32, -bd1, bd1)
    g1 = jnp.ones((1, proj_dim), jnp.float32)
    bt1 = jnp.zeros((1, proj_dim), jnp.float32)
    bd2 = 1.0 / (proj_dim ** 0.5)
    w3 = jax.random.uniform(k3, (proj_dim, out_dim), jnp.float32, -bd2, bd2)
    b3 = jax.random.uniform(k4, (1, out_dim), jnp.float32, -bd2, bd2)
    g2 = jnp.ones((1, out_dim), jnp.float32)
    bt2 = jnp.zeros((1, out_dim), jnp.float32)
    return w1, b1, g1, bt1, w3, b3, g2, bt2


def simclr_reference(x, w1, b1, g1, bt1, w3, b3, g2, bt2, *, bf16_matmul=False):
    """Plain-JAX reference of the PyTorch forward (training-mode BN)."""
    def mm(a, b):
        if bf16_matmul:
            a, b = a.astype(jnp.bfloat16), b.astype(jnp.bfloat16)
        return jnp.dot(a, b, preferred_element_type=jnp.float32)

    z1 = mm(x, w1) + b1
    m1 = jnp.mean(z1, axis=0, keepdims=True)
    v1 = jnp.mean((z1 - m1) ** 2, axis=0, keepdims=True)
    h1 = jnp.maximum((z1 - m1) / jnp.sqrt(v1 + EPS) * g1 + bt1, 0.0)
    z2 = mm(h1, w3) + b3
    m2 = jnp.mean(z2, axis=0, keepdims=True)
    v2 = jnp.mean((z2 - m2) ** 2, axis=0, keepdims=True)
    return (z2 - m2) / jnp.sqrt(v2 + EPS) * g2 + bt2


if __name__ == "__main__":
    # batch, in_features(=args.hidden_dim), projection_dim, cluster_hidden_dim
    B, F, H, O = 48, 40, 64, 32

    key = jax.random.PRNGKey(0)
    kx, kp = jax.random.split(key)
    x = jax.random.normal(kx, (B, F), jnp.float32)
    params = init_params(kp, F, H, O)

    # tb=32 -> batch padded to 64, grid of 2, exercises masked stats + accum.
    out = simclr_forward(x, *params, tb=32)
    jax.block_until_ready(out)

    ref_match = simclr_reference(x, *params, bf16_matmul=True)   # same numerics
    ref_f32 = simclr_reference(x, *params, bf16_matmul=False)    # full precision

    assert out.shape == (B, O)
    assert jnp.allclose(out, ref_match, atol=1e-2, rtol=1e-2), (
        jnp.max(jnp.abs(out - ref_match)))
    assert jnp.mean(jnp.abs(out - ref_f32)) < 5e-2, (
        jnp.mean(jnp.abs(out - ref_f32)))

    print("KERNEL_OK")
</pallas_src>

<mosaic_0001>
module attributes {stable_mosaic.version = 11 : i64} {
  func.func @linear_stats_kernel(%arg0: i32, %arg1: memref<32x128xf32, #tpu.memory_space<vmem>>, %arg2: memref<128x128xf32, #tpu.memory_space<vmem>>, %arg3: memref<1x128xf32, #tpu.memory_space<vmem>>, %arg4: memref<32x128xf32, #tpu.memory_space<vmem>>, %arg5: memref<1x128xf32, #tpu.memory_space<vmem>>, %arg6: memref<1x128xf32, #tpu.memory_space<vmem>>) attributes {dimension_semantics = [#tpu.dimension_semantics<arbitrary>], iteration_bounds = array<i64: 2>, scalar_prefetch = 0 : i64, scratch_operands = 0 : i64, tpu.core_type = #tpu.core_type<tc>, window_params = [{transform_indices = @transform_0, window_bounds = array<i64: 32, 128>}, {pipeline_mode = #tpu.pipeline_mode<synchronous>, transform_indices = @transform_1, window_bounds = array<i64: 128, 128>}, {pipeline_mode = #tpu.pipeline_mode<synchronous>, transform_indices = @transform_2, window_bounds = array<i64: 1, 128>}, {transform_indices = @transform_3, window_bounds = array<i64: 32, 128>}, {pipeline_mode = #tpu.pipeline_mode<synchronous>, transform_indices = @transform_4, window_bounds = array<i64: 1, 128>}, {pipeline_mode = #tpu.pipeline_mode<synchronous>, transform_indices = @transform_5, window_bounds = array<i64: 1, 128>}]} {
    %c0 = arith.constant 0 : index
    %c0_0 = arith.constant 0 : index
    %0 = vector.load %arg1[%c0, %c0_0] : memref<32x128xf32, #tpu.memory_space<vmem>>, vector<32x128xf32>
    %1 = arith.truncf %0 : vector<32x128xf32> to vector<32x128xbf16>
    %c0_1 = arith.constant 0 : index
    %c0_2 = arith.constant 0 : index
    %2 = vector.load %arg2[%c0_1, %c0_2] : memref<128x128xf32, #tpu.memory_space<vmem>>, vector<128x128xf32>
    %3 = arith.truncf %2 : vector<128x128xf32> to vector<128x128xbf16>
    %cst = arith.constant dense<0.000000e+00> : vector<32x128xf32>
    %4 = tpu.matmul %1, %3, %cst {dimension_numbers = #tpu.dot_dimension_numbers<[1], [0], [0], [1], [0, 0, 1, 1], [], []>} : vector<32x128xbf16>, vector<128x128xbf16>, vector<32x128xf32> -> vector<32x128xf32>
    %c0_3 = arith.constant 0 : index
    %c0_4 = arith.constant 0 : index
    %5 = vector.load %arg3[%c0_3, %c0_4] : memref<1x128xf32, #tpu.memory_space<vmem>>, vector<1x128xf32>
    %6 = vector.broadcast %5 : vector<1x128xf32> to vector<32x128xf32>
    %7 = arith.addf %4, %6 : vector<32x128xf32>
    %c0_5 = arith.constant 0 : index
    %c0_6 = arith.constant 0 : index
    %8 = vector.load %arg4[%c0_5, %c0_6] : memref<32x128xf32, #tpu.memory_space<vmem>>, vector<32x128xf32>
    tpu.vector_store %arg4[%c0_5, %c0_6], %7 {strides = array<i32>} : memref<32x128xf32, #tpu.memory_space<vmem>>, vector<32x128xf32>,
    %c32_i32 = arith.constant 32 : i32
    %9 = arith.muli %arg0, %c32_i32 : i32
    %10 = tpu.iota {dimensions = array<i32: 0>} : vector<32x128xi32>
    %11 = vector.broadcast %9 : i32 to vector<32x128xi32>
    %12 = arith.addi %11, %10 : vector<32x128xi32>
    %c48_i32 = arith.constant 48 : i32
    %13 = vector.broadcast %c48_i32 : i32 to vector<32x128xi32>
    %14 = arith.cmpi slt, %12, %13 : vector<32x128xi32>
    %cst_7 = arith.constant 0.000000e+00 : f32
    %15 = vector.broadcast %cst_7 : f32 to vector<32x128xf32>
    %16 = arith.select %14, %7, %15 : vector<32x128xi1>, vector<32x128xf32>
    %c0_i32 = arith.constant 0 : i32
    %17 = arith.cmpi eq, %arg0, %c0_i32 : i32
    %18 = arith.extui %17 : i1 to i32
    %c0_i32_8 = arith.constant 0 : i32
    %19 = arith.cmpi ne, %18, %c0_i32_8 : i32
    scf.if %19 {
      %cst_19 = arith.constant 0.000000e+00 : f32
      %31 = vector.broadcast %cst_19 : f32 to vector<1x128xf32>
      %c0_20 = arith.constant 0 : index
      %c0_21 = arith.constant 0 : index
      %32 = vector.load %arg5[%c0_20, %c0_21] : memref<1x128xf32, #tpu.memory_space<vmem>>, vector<1x128xf32>
      tpu.vector_store %arg5[%c0_20, %c0_21], %31 {strides = array<i32>} : memref<1x128xf32, #tpu.memory_space<vmem>>, vector<1x128xf32>,
      %cst_22 = arith.constant 0.000000e+00 : f32
      %33 = vector.broadcast %cst_22 : f32 to vector<1x128xf32>
      %c0_23 = arith.constant 0 : index
      %c0_24 = arith.constant 0 : index
      %34 = vector.load %arg6[%c0_23, %c0_24] : memref<1x128xf32, #tpu.memory_space<vmem>>, vector<1x128xf32>
      tpu.vector_store %arg6[%c0_23, %c0_24], %33 {strides = array<i32>} : memref<1x128xf32, #tpu.memory_space<vmem>>, vector<1x128xf32>,
    } else {
    }
    %c0_9 = arith.constant 0 : index
    %c0_10 = arith.constant 0 : index
    %20 = vector.load %arg5[%c0_9, %c0_10] : memref<1x128xf32, #tpu.memory_space<vmem>>, vector<1x128xf32>
    %cst_11 = arith.constant dense<0.000000e+00> : vector<128xf32>
    %21 = vector.multi_reduction <add>, %16, %cst_11 [0] : vector<32x128xf32> to vector<128xf32>
    %22 = vector.shape_cast %21 : vector<128xf32> to vector<1x128xf32>
    %23 = arith.addf %20, %22 : vector<1x128xf32>
    %c0_12 = arith.constant 0 : index
    %c0_13 = arith.constant 0 : index
    %24 = vector.load %arg5[%c0_12, %c0_13] : memref<1x128xf32, #tpu.memory_space<vmem>>, vector<1x128xf32>
    tpu.vector_store %arg5[%c0_12, %c0_13], %23 {strides = array<i32>} : memref<1x128xf32, #tpu.memory_space<vmem>>, vector<1x128xf32>,
    %c0_14 = arith.constant 0 : index
    %c0_15 = arith.constant 0 : index
    %25 = vector.load %arg6[%c0_14, %c0_15] : memref<1x128xf32, #tpu.memory_space<vmem>>, vector<1x128xf32>
    %26 = arith.mulf %16, %16 : vector<32x128xf32>
    %cst_16 = arith.constant dense<0.000000e+00> : vector<128xf32>
    %27 = vector.multi_reduction <add>, %26, %cst_16 [0] : vector<32x128xf32> to vector<128xf32>
    %28 = vector.shape_cast %27 : vector<128xf32> to vector<1x128xf32>
    %29 = arith.addf %25, %28 : vector<1x128xf32>
    %c0_17 = arith.constant 0 : index
    %c0_18 = arith.constant 0 : index
    %30 = vector.load %arg6[%c0_17, %c0_18] : memref<1x128xf32, #tpu.memory_space<vmem>>, vector<1x128xf32>
    tpu.vector_store %arg6[%c0_17, %c0_18], %29 {strides = array<i32>} : memref<1x128xf32, #tpu.memory_space<vmem>>, vector<1x128xf32>,
    return
  }
  func.func @transform_0(%arg0: i32) -> (i32, i32) {
    %c0_i32 = arith.constant 0 : i32
    %c0_i32_0 = arith.constant 0 : i32
    return %arg0, %c0_i32 : i32, i32
  }
  func.func @transform_1(%arg0: i32) -> (i32, i32) {
    %c0_i32 = arith.constant 0 : i32
    %c0_i32_0 = arith.constant 0 : i32
    %c0_i32_1 = arith.constant 0 : i32
    return %c0_i32, %c0_i32_0 : i32, i32
  }
  func.func @transform_2(%arg0: i32) -> (i32, i32) {
    %c0_i32 = arith.constant 0 : i32
    %c0_i32_0 = arith.constant 0 : i32
    %c0_i32_1 = arith.constant 0 : i32
    return %c0_i32, %c0_i32_0 : i32, i32
  }
  func.func @transform_3(%arg0: i32) -> (i32, i32) {
    %c0_i32 = arith.constant 0 : i32
    %c0_i32_0 = arith.constant 0 : i32
    return %arg0, %c0_i32 : i32, i32
  }
  func.func @transform_4(%arg0: i32) -> (i32, i32) {
    %c0_i32 = arith.constant 0 : i32
    %c0_i32_0 = arith.constant 0 : i32
    %c0_i32_1 = arith.constant 0 : i32
    return %c0_i32, %c0_i32_0 : i32, i32
  }
  func.func @transform_5(%arg0: i32) -> (i32, i32) {
    %c0_i32 = arith.constant 0 : i32
    %c0_i32_0 = arith.constant 0 : i32
    %c0_i32_1 = arith.constant 0 : i32
    return %c0_i32, %c0_i32_0 : i32, i32
  }
}

</mosaic_0001>

<bundles_post_ra>
// kernel: tpu_custom_call.1
= control target key start
LH: loop header
LB: loop body
LE: loop exit
PB: predicated region body
PF: predicated region fallthrough
CT: control target
= control target key end

     0   :  { %11 = vsyncpa [#allocation3], 0  ;;  %s1176_s0 = inlined_call_operand.hbm [shape: f32[64,128], index: 0, kind: input, shape index: {}]   ;;  %s1177_s1 = inlined_call_operand.hbm [shape: f32[128,128], index: 1, kind: input, shape index: {}]   ;;  %s1178_s2 = inlined_call_operand.vmem [shape: f32[1,128], index: 2, kind: input, shape index: {}]   ;;  %s1179_s3 = inlined_call_operand.hbm [shape: f32[64,128], index: 3, kind: output, shape index: {0}]   ;;  %s1180_s4 = inlined_call_operand.hbm [shape: f32[1,128], index: 4, kind: output, shape index: {1}]   ;;  %s1181_s5 = inlined_call_operand.hbm [shape: f32[1,128], index: 5, kind: output, shape index: {2}]  }
   0x1   :  { %13 = vsyncpa [#allocation3 + $0x1], 0 }
   0x2   :  { %14 = vsyncpa [#allocation6], 0 }
   0x3   :  { %15 = vsyncpa [#allocation4], 0 }
   0x4   :  { %17 = vsyncpa [#allocation4 + $0x1], 0 }
   0x5   :  { %18 = vsyncpa [#allocation9], 0  ;;  %s897_s18 = smov 0   ;;  %s899_s19 = smov 0  }
   0x6   :  { %s901_s20 = smov 0   ;;  %s903_s21 = smov 0  }
   0x7 LB: > { %s918_s22 = sadd.s32 4294967295, %s855_s21   ;;  %s540_s23 = sadd.s32 4294967294, %s855_s21   ;;  %s855_s21 = sphi %s903_s21, %s1209_s21   ;;  %s851_s20 = sphi %s901_s20, %s1208_s20   ;;  %s847_s19 = sphi %s899_s19, %s1207_s19   ;;  %s843_s18 = sphi %s897_s18, %s1206_s18  }
   0x8   : > { %p44_p0 = scmp.ne.s32.totalorder %s847_s19, %s843_s18  ;;  %p1182_p1 = scmp.eq.s32.totalorder %s918_s22, 0 }
   0x9   : > { %p116_p3 = scmp.eq.s32.totalorder %s540_s23, 1  ;;  %p541_p5 = scmp.ge.s32.totalorder %s855_s21, 1 }
   0xa   : > { %p927_p4 = por %p1182_p1, %p44_p0  ;;  %p165_p7 = scmp.lt.s32.totalorder %s855_s21, 3 }
   0xb   : > { %p932_p6 = por %p116_p3, %p44_p0  ;;  %s857_s27 = smov [#allocation5]  }
   0xc   : > { %s1185_s24 = scalar_select %p927_p4, 1, 0 }
   0xd   : > { %s1186_s25 = scalar_select %p932_p6, 1, 0 }
   0xe   : > { %p938_p9 = pnand %p541_p5, %p165_p7  ;;  %s177_s28 = sshll.u32 %s857_s27, 4  ;;  %s942_s28 = int_to_ptr.vmem [resolvable:$true] %s177_s28 }
   0xf   : > { %s954_s30 = sadd.s32 1, %s855_s21   ;;  %s31_s6 = sadd.s32 1, %s851_s20 }
  0x10   : > { %s1187_s26 = scalar_select %p938_p9, 1, 0 }
  0x11   : > { %p611_p10 = pneg %p938_p9  ;;  %s28_s7 = ssub.s32 %s855_s21, %s954_s30 }
  0x12   : > { %s671_s10 = scalar_lea.hbm %s1177_s1, 2048 }
  0x13   : > { %p949_p12 = pnand %p611_p10, %p1182_p1  ;;  %p672_p13 = scmp.ne.s32.totalorder %s1177_s1, %s671_s10 }
  0x14   : > { %p678_p7 = scmp.lt.u32.totalorder %s671_s10, %s1177_s1 }
  0x15   : > { %p673_p0 = pneg %p949_p12 }
  0x17   : > { %p674_p3 = pnand %p673_p0, %p672_p13 }
  0x19   : > { %p675_p5 = pneg %p674_p3 }
  0x1b   : > { %p680_p10 = pnand %p678_p7, %p675_p5 }
  0x1d   : > { %683 = shalt.err (!%p680_p10)
}
  0x1e   : > { %s684_s15 = scalar_lea.vmem %s942_s28, 2048  ;;  %p692_p2 = scmp.lt.s32.totalorder %s942_s28, %s942_s28 }
  0x1f   : > { %p685_p11 = scmp.ne.s32.totalorder %s942_s28, %s684_s15  ;;  %p693_p6 = scmp.lt.s32.totalorder %s684_s15, %s684_s15 }
  0x21   : > { %p687_p8 = pnand %p685_p11, %p673_p0  ;;  %p694_p4 = por %p693_p6, %p692_p2 }
  0x23   : > { %p688_p1 = pneg %p687_p8 }
  0x25   : > { %p695_p9 = pnand %p694_p4, %p688_p1 }
  0x27   : > { %698 = shalt.err (!%p695_p9)
}
  0x28   : > { %s858_s16 = smov 128   ;;  %s859_s17 = smov 8  }
  0x29   : > { %614 = dma.hbm_to_vmem [thread:$0]  (!%p949_p12), %s1177_s1, 2048, %s942_s28, [#allocation6], %s858_s16, %s858_s16, %s859_s17  }
  0x2a   : > { %p29_p1 = scmp.eq.s32.totalorder %s28_s7, 0  ;;  %p38_p2 = scmp.ne.s32.totalorder %s851_s20, %s847_s19 }
  0x2b   : > { %p39_p4 = scmp.eq.s32.totalorder %s855_s21, 0  ;;  %p624_p6 = scmp.lt.s32.totalorder %s855_s21, 2 }
  0x2c   : > { %s988_s8 = scalar_select %p29_p1, %s851_s20, %s31_s6  }
  0x2d   : > { %p40_p8 = por %p39_p4, %p38_p2  ;;  %p1189_p9 = scmp.eq.s32.totalorder %s918_s22, 1 }
  0x2e   : > { %s194_s29 = sand.u32 1, %s851_s20   ;;  %s563_s10 = sshll.u32 %s855_s21, 9 }
  0x2f   : > { %p992_p11 = por %p1189_p9, %p38_p2  ;;  %s544_s11 = sshll.u32 %s194_s29, 5 }
  0x30   : > { %s1001_s14 = scalar_lea.hbm %s1176_s0, %s563_s10  ;;  %s198_s28 = scalar_lea.vmem [#allocation2], %s544_s11 }
  0x31   : > { %s205_s6 = sshll.u32 %s198_s28, 4  ;;  %p1003_p12 = pnand %p624_p6, %p40_p8  ;;  %s1007_s6 = int_to_ptr.vmem [resolvable:$true] %s205_s6 }
  0x32   : > { %s1009_s15 = scalar_lea.sflag [#allocation3], %s194_s29  ;;  %s699_s23 = scalar_lea.hbm %s1001_s14, 512 }
  0x33   : > { %p700_p13 = scmp.ne.s32.totalorder %s1001_s14, %s699_s23  ;;  %p701_p0 = pneg %p1003_p12 }
  0x34   : > { %s704_s11 = scalar_lea.hbm %s1176_s0, 1024  ;;  %p705_p7 = scmp.lt.u32.totalorder %s1001_s14, %s1176_s0 }
  0x35   : > { %p702_p3 = pnand %p701_p0, %p700_p13  ;;  %p706_p10 = scmp.lt.u32.totalorder %s704_s11, %s699_s23 }
  0x36   : > { %p708_p2 = scmp.lt.u32.totalorder %s699_s23, %s1001_s14 }
  0x37   : > { %p703_p5 = pneg %p702_p3  ;;  %p707_p1 = por %p706_p10, %p705_p7 }
  0x39   : > { %p709_p4 = por %p708_p2, %p707_p1 }
  0x3b   : > { %p710_p6 = pnand %p709_p4, %p703_p5 }
  0x3d   : > { %713 = shalt.err (!%p710_p6)
}
  0x3e   : > { %s714_s29 = scalar_lea.vmem %s1007_s6, 512  ;;  %s860_s28 = smov [#allocation2]  }
  0x3f   : > { %p715_p8 = scmp.ne.s32.totalorder %s1007_s6, %s714_s29  ;;  %s719_s27 = sshll.u32 %s860_s28, 4  ;;  %s720_s27 = int_to_ptr.vmem [resolvable:$false] %s719_s27 }
  0x40   : > { %s721_s10 = scalar_lea.vmem %s720_s27, 1024  ;;  %p722_p3 = scmp.lt.s32.totalorder %s1007_s6, %s720_s27 }
  0x41   : > { %p717_p9 = pnand %p715_p8, %p701_p0  ;;  %p723_p7 = scmp.lt.s32.totalorder %s721_s10, %s714_s29 }
  0x43   : > { %p718_p13 = pneg %p717_p9  ;;  %p724_p10 = por %p723_p7, %p722_p3 }
  0x45   : > { %p725_p1 = pnand %p724_p10, %p718_p13 }
  0x47   : > { %728 = shalt.err (!%p725_p1)
}
  0x48   : > { %618 = dma.hbm_to_vmem [thread:$0]  (!%p1003_p12), %s1001_s14, 512, %s1007_s6, %s1009_s15, %s858_s16, %s858_s16, %s859_s17  }
  0x49   : > { %p1192_p0 = scmp.ne.s32.totalorder %s1187_s26, 0 }
  0x4a   : > { %s1043_s23 = sand.u32 (!%p1192_p0), 1, %s847_s19   ;;  %p1193_p5 = scmp.ne.s32.totalorder (!%p1192_p0), %s1185_s24, 0 }
  0x4b   : > { %217 = sbr.rel (%p1192_p0) target bundleno = 413 (0x19d), region = 32  ;;  %s548_s11 = sshll.u32 (!%p1192_p0), %s1043_s23, 5 }
  0x4c   : > { %s220_s12 = scalar_lea.sflag (!%p1192_p0), [#allocation3], %s1043_s23  ;;  %s1049_s7 = scalar_lea.vmem (!%p1192_p0), [#allocation2], %s548_s11 }
  0x52   : > { %826 = dma.done.wait (%p1193_p5), %s220_s12, 512  }
  0x53   : > { %828 = vsyncadd (%p1193_p5), %s220_s12, 4294966784  ;;  %p1194_p12 = scmp.eq.s32.totalorder %s918_s22, 0 }
  0x55   : > { %830 = dma.done.wait (%p1194_p12), [#allocation6], 2048   ;;  %p1195_p2 = pmov %p1194_p12 }
  0x56   : > { %v263_v0 = vld [vmem:[#allocation5] sm:$0xff]  ;;  %v264_v1 = vld [vmem:[#allocation5 + $0x8] sm:$0xff]  ;;  %v265_v2 = vld [vmem:[#allocation5 + $0x10] sm:$0xff]  ;;  %v348_v30 = vlaneseq  ;;  %s552_s24 = sshll.u32 %s918_s22, 5  ;;  %s1069_s17 = scalar_lea.vmem [#allocation7], %s548_s11 }
  0x57   : > { %832 = vsyncadd (%p1195_p2), [#allocation6], 4294965248  ;;  %v279_v3 = vpack.c.bf16 %v264_v1, %v263_v0  ;;  %v266_v4 = vld [vmem:[#allocation5 + $0x18] sm:$0xff]  ;;  %v267_v6 = vld [vmem:[#allocation5 + $0x20] sm:$0xff]  ;;  %v353_v33 = vstv %s552_s24  ;;  %p1196_p4 = scmp.ne.s32.totalorder %s918_s22, 0 }
  0x58   : > { %v280_v5 = vpack.c.bf16 %v266_v4, %v265_v2  ;;  %v268_v7 = vld [vmem:[#allocation5 + $0x28] sm:$0xff]  ;;  %v257_v9 = vld [vmem:[%s1049_s7] sm:$0xff]  ;;  %v269_v11 = vld [vmem:[#allocation5 + $0x30] sm:$0xff]  ;;  %v349_v31 = vshrl.u32 %v348_v30, 7  ;;  %v861_v53 = vmov (!%p1196_p4), 0.0  }
  0x59   : > { %575 = vmatprep.subr.bf16.mxu0 %v279_v3  ;;  %v281_v8 = vpack.c.bf16 %v268_v7, %v267_v6  ;;  %v258_v10 = vld [vmem:[%s1049_s7 + $0x8] sm:$0xff]  ;;  %v270_v12 = vld [vmem:[#allocation5 + $0x38] sm:$0xff]  ;;  %v271_v15 = vld [vmem:[#allocation5 + $0x40] sm:$0xff]  ;;  %370 = vst [vmem:[#allocation8] sm:$0x1] (!%p1196_p4), %v861_v53 }
  0x5a   : > { %576 = vmatpush3.bf16.msra.mxu0 %v279_v3  ;;  %v261_v13 = vpack.c.bf16 %v258_v10, %v257_v9  ;;  %v282_v14 = vpack.c.bf16 %v270_v12, %v269_v11  ;;  %v272_v16 = vld [vmem:[#allocation5 + $0x48] sm:$0xff]  ;;  %v273_v18 = vld [vmem:[#allocation5 + $0x50] sm:$0xff]  ;;  %v274_v19 = vld [vmem:[#allocation5 + $0x58] sm:$0xff]  ;;  %v351_v32 = vadd.s32 16, %v349_v31  ;;  %v352_v34 = vadd.s32 24, %v349_v31 }
  0x5b   : > { %577 = vmatprep.subr.bf16.mxu0 %v280_v5  ;;  %v283_v17 = vpack.c.bf16 %v272_v16, %v271_v15  ;;  %v284_v20 = vpack.c.bf16 %v274_v19, %v273_v18  ;;  %v275_v21 = vld [vmem:[#allocation5 + $0x60] sm:$0xff]  ;;  %v276_v22 = vld [vmem:[#allocation5 + $0x68] sm:$0xff]  ;;  %v277_v24 = vld [vmem:[#allocation5 + $0x70] sm:$0xff]  ;;  %v350_v35 = vadd.s32 8, %v349_v31  ;;  %v354_v37 = vadd.s32 %v353_v33, %v349_v31  ;;  %371 = vst [vmem:[#allocation10] sm:$0x1] (!%p1196_p4), %v861_v53 }
  0x5c   : > { %591 = vmatprep.mubr.bf16.mxu0 %v261_v13  ;;  %v285_v23 = vpack.c.bf16 %v276_v22, %v275_v21  ;;  %v278_v25 = vld [vmem:[#allocation5 + $0x78] sm:$0xff]  ;;  %v259_v27 = vld [vmem:[%s1049_s7 + $0x10] sm:$0xff]  ;;  %v356_v36 = vadd.s32 %v353_v33, %v351_v32  ;;  %v551_v38 = vld [vmem:[%s1178_s2] ss:$0 sm:$0xff]  ;;  %v357_v39 = vadd.s32 %v353_v33, %v352_v34 }
  0x5d   : > { %v286_v26 = vpack.c.bf16 %v278_v25, %v277_v24  ;;  %v260_v28 = vld [vmem:[%s1049_s7 + $0x18] sm:$0xff]  ;;  %v355_v40 = vadd.s32 %v353_v33, %v350_v35  ;;  %vm358_vm1 = vcmp.lt.s32.totalorder %v354_v37, 48 }
  0x5e   : > { %578 = vmatpush3.bf16.msra.mxu0 %v280_v5  ;;  %v262_v29 = vpack.c.bf16 %v260_v28, %v259_v27  ;;  %vm360_vm0 = vcmp.lt.s32.totalorder %v356_v36, 48  ;;  %vm361_vm2 = vcmp.lt.s32.totalorder %v357_v39, 48 }
  0x5f   : > { %579 = vmatprep.subr.bf16.mxu0 %v281_v8  ;;  %vm359_vm3 = vcmp.lt.s32.totalorder %v355_v40, 48 }
  0x62   : > { %580 = vmatpush3.bf16.msra.mxu0 %v281_v8 }
  0x63   : > { %581 = vmatprep.subr.bf16.mxu0 %v282_v14 }
  0x66   : > { %582 = vmatpush3.bf16.msra.mxu0 %v282_v14 }
  0x67   : > { %583 = vmatprep.subr.bf16.mxu0 %v283_v17 }
  0x6a   : > { %584 = vmatpush3.bf16.msra.mxu0 %v283_v17 }
  0x6b   : > { %585 = vmatprep.subr.bf16.mxu0 %v284_v20 }
  0x6e   : > { %586 = vmatpush3.bf16.msra.mxu0 %v284_v20 }
  0x6f   : > { %587 = vmatprep.subr.bf16.mxu0 %v285_v23 }
  0x72   : > { %588 = vmatpush3.bf16.msra.mxu0 %v285_v23 }
  0x73   : > { %589 = vmatprep.subr.bf16.mxu0 %v286_v26 }
  0x76   : > { %590 = vmatpush3.bf16.msra.mxu0 %v286_v26 }
  0x79   : > { %592 = vmatmul.mubr.bf16.vlgmr.msra.gmra.mrb[0].mxu0 %v262_v29 }
 0x14c   : > { %v593_v41 = vpop.f32.mrb[0].mxu0  ;;  %369 = sbr.rel (%p1196_p4) target bundleno = 339 (0x153), region = 44 }
 0x14d   : > { %v337_v42 = vadd.f32 %v593_v41, %v551_v38  ;;  %v328_v43 = vpop.f32.mrb[1].mxu0 }
 0x14e   : > { %v329_v44 = vadd.f32 %v551_v38, %v328_v43  ;;  %v594_v45 = vpop.f32.mrb[2].mxu0 }
 0x14f   : > { %345 = vst [vmem:[%s1069_s17 + $0x10] sm:$0xff] %v337_v42  ;;  %v364_v46 = vsel %vm360_vm0, %v337_v42, 0.0  ;;  %v340_v47 = vadd.f32 %v594_v45, %v551_v38  ;;  %v331_v48 = vpop.f32.mrb[3].mxu0 }
 0x150   : > { %343 = vst [vmem:[%s1069_s17] sm:$0xff] %v329_v44  ;;  %v362_v49 = vsel %vm358_vm1, %v329_v44, 0.0  ;;  %v332_v50 = vadd.f32 %v551_v38, %v331_v48 }
 0x151   : > { %346 = vst [vmem:[%s1069_s17 + $0x18] sm:$0xff] %v340_v47  ;;  %v365_v51 = vsel %vm361_vm2, %v340_v47, 0.0 }
 0x152   : > { %344 = vst [vmem:[%s1069_s17 + $0x8] sm:$0xff] %v332_v50  ;;  %v363_v52 = vsel %vm359_vm3, %v332_v50, 0.0 }
 0x153 PF: > { %v373_v54 = vadd.f32 %v363_v52, %v362_v49  ;;  %v385_v55 = vmul.f32 %v362_v49, %v362_v49  ;;  %v386_v56 = vmul.f32 %v363_v52, %v363_v52  ;;  %v387_v57 = vmul.f32 %v364_v46, %v364_v46  ;;  %s564_s14 = sshll.u32 %s918_s22, 9  ;;  %s414_s29 = sshll.u32 %s1069_s17, 4  ;;  %s1084_s29 = int_to_ptr.vmem [resolvable:$true] %s414_s29 }
 0x154   : > { %v388_v59 = vmul.f32 %v365_v51, %v365_v51  ;;  %s1081_s13 = scalar_lea.hbm %s1179_s3, %s564_s14  ;;  %s401_s28 = scalar_lea.sflag [#allocation4], %s1043_s23 }
 0x155   : > { %v374_v58 = vadd.f32 %v373_v54, %v364_v46  ;;  %v389_v60 = vadd.f32 %v386_v56, %v385_v55  ;;  %s729_s27 = scalar_lea.vmem %s1084_s29, 512  ;;  %s862_s10 = smov [#allocation7]  }
 0x156   : > { %p730_p6 = scmp.ne.s32.totalorder %s1084_s29, %s729_s27  ;;  %s733_s11 = sshll.u32 %s862_s10, 4  ;;  %s734_s11 = int_to_ptr.vmem [resolvable:$false] %s733_s11 }
 0x157   : > { %v375_v61 = vadd.f32 %v374_v58, %v365_v51  ;;  %v390_v62 = vadd.f32 %v389_v60, %v387_v57  ;;  %s735_s12 = scalar_lea.vmem %s734_s11, 1024  ;;  %p736_p13 = scmp.lt.s32.totalorder %s1084_s29, %s734_s11 }
 0x158   : > { %p731_p8 = pnand %p730_p6, %p992_p11  ;;  %p737_p3 = scmp.lt.s32.totalorder %s735_s12, %s729_s27 }
 0x159   : > { %v376_v63 = vrot.slane %v375_v61, 4  ;;  %v391_v0 = vadd.f32 %v390_v62, %v388_v59 }
 0x15a   : > { %p732_p9 = pneg %p731_p8  ;;  %p738_p7 = por %p737_p3, %p736_p13 }
 0x15c   : > { %p739_p10 = pnand %p738_p7, %p732_p9 }
 0x15e   : > { %742 = shalt.err (!%p739_p10)
}
 0x15f   : > { %s743_s7 = scalar_lea.hbm %s1081_s13, 512  ;;  %s747_s16 = scalar_lea.hbm %s1179_s3, 1024 }
 0x160   : > { %p744_p1 = scmp.ne.s32.totalorder %s1081_s13, %s743_s7  ;;  %p748_p12 = scmp.lt.u32.totalorder %s1081_s13, %s1179_s3 }
 0x161   : > { %p749_p2 = scmp.lt.u32.totalorder %s747_s16, %s743_s7  ;;  %p751_p6 = scmp.lt.u32.totalorder %s743_s7, %s1081_s13 }
 0x162   : > { %p745_p0 = pnand %p744_p1, %p992_p11 }
 0x163   : > { %p750_p4 = por %p749_p2, %p748_p12 }
 0x164   : > { %p746_p5 = pneg %p745_p0 }
 0x165   : > { %p752_p8 = por %p751_p6, %p750_p4 }
 0x167   : > { %p753_p9 = pnand %p752_p8, %p746_p5 }
 0x169   : > { %756 = shalt.err (!%p753_p9)
}
 0x16a   : > { %s863_s6 = smov 128   ;;  %s864_s15 = smov 8   ;;  %v377_v1 = vadd.f32 %v376_v63, %v375_v61  ;;  %v392_v2 = vrot.slane %v391_v0, 4  ;;  %v372_v9 = vld [vmem:[#allocation8] sm:$0x1] }
 0x16b   : > { %601 = dma.vmem_to_hbm [thread:$0]  (%p992_p11), %s1084_s29, 512, %s1081_s13, %s401_s28, %s863_s6, %s863_s6, %s864_s15   ;;  %v384_v12 = vld [vmem:[#allocation10] sm:$0x1] }
 0x16c   : > { %v378_v3 = vrot.slane %v377_v1, 2  ;;  %v393_v4 = vadd.f32 %v392_v2, %v391_v0  ;;  %s865_s27 = smov [#allocation8]   ;;  %s866_s11 = smov [#allocation10]  }
 0x16d   : > { %s428_s10 = sshll.u32 %s865_s27, 4  ;;  %s439_s12 = sshll.u32 %s866_s11, 4  ;;  %s429_s10 = int_to_ptr.vmem [resolvable:$true] %s428_s10  ;;  %s1110_s12 = int_to_ptr.vmem [resolvable:$true] %s439_s12 }
 0x16e   : > { %v379_v5 = vadd.f32 %v378_v3, %v377_v1  ;;  %v394_v6 = vrot.slane %v393_v4, 2  ;;  %s757_s9 = scalar_lea.vmem %s429_s10, 16  ;;  %p1197_p13 = scmp.eq.s32.totalorder %s918_s22, 1 }
 0x16f   : > { %p758_p11 = scmp.ne.s32.totalorder %s429_s10, %s757_s9  ;;  %s763_s23 = scalar_lea.vmem %s429_s10, 32 }
 0x170   : > { %v380_v7 = vrot.slane %v379_v5, 1  ;;  %v395_v8 = vadd.f32 %v394_v6, %v393_v4  ;;  %p764_p10 = scmp.lt.s32.totalorder %s429_s10, %s429_s10  ;;  %p765_p1 = scmp.lt.s32.totalorder %s763_s23, %s757_s9 }
 0x171   : > { %p759_p3 = pnand %p758_p11, %p1197_p13 }
 0x172   : > { %v381_v10 = vadd.f32 %v380_v7, %v379_v5  ;;  %v396_v11 = vrot.slane %v395_v8, 1  ;;  %p766_p0 = por %p765_p1, %p764_p10 }
 0x173   : > { %p760_p7 = pneg %p759_p3 }
 0x174   : > { %v382_v13 = vadd.f32 %v381_v10, %v372_v9  ;;  %v397_v14 = vadd.f32 %v396_v11, %v395_v8 }
 0x175   : > { %p767_p5 = pnand %p766_p0, %p760_p7 }
 0x176   : > { %383 = vst [vmem:[#allocation8] sm:$0x1] %v382_v13  ;;  %v398_v15 = vadd.f32 %v397_v14, %v384_v12 }
 0x177   : > { %770 = shalt.err (!%p767_p5)
}
 0x178   : > { %s771_s28 = scalar_lea.hbm %s1180_s4, 16  ;;  %p1198_p2 = pmov %p1197_p13 }
 0x179   : > { %p772_p12 = scmp.ne.s32.totalorder %s1180_s4, %s771_s28  ;;  %p777_p8 = scmp.lt.u32.totalorder %s771_s28, %s1180_s4 }
 0x17b   : > { %p773_p4 = pnand %p772_p12, %p1198_p2 }
 0x17d   : > { %p774_p6 = pneg %p773_p4 }
 0x17f   : > { %p779_p9 = pnand %p777_p8, %p774_p6 }
 0x181   : > { %782 = shalt.err (!%p779_p9)
}
 0x182   : > { %p1199_p11 = pmov %p1198_p2  ;;  %399 = vst [vmem:[#allocation10] sm:$0x1] %v398_v15  ;;  %s783_s6 = scalar_lea.vmem %s1110_s12, 16 }
 0x183   : > { %p784_p13 = scmp.ne.s32.totalorder %s1110_s12, %s783_s6  ;;  %p1200_p3 = pmov %p1198_p2 }
 0x184   : > { %603 = dma.vmem_to_hbm [thread:$0]  (%p1199_p11), %s429_s10, 16, %s1180_s4, [#allocation9]  }
 0x185   : > { %p785_p7 = pnand %p784_p13, %p1200_p3  ;;  %s789_s15 = scalar_lea.vmem %s1110_s12, 32 }
 0x186   : > { %p790_p1 = scmp.lt.s32.totalorder %s1110_s12, %s1110_s12  ;;  %p791_p0 = scmp.lt.s32.totalorder %s789_s15, %s783_s6 }
 0x187   : > { %p786_p10 = pneg %p785_p7 }
 0x188   : > { %p792_p5 = por %p791_p0, %p790_p1 }
 0x18a   : > { %p793_p12 = pnand %p792_p5, %p786_p10 }
 0x18c   : > { %796 = shalt.err (!%p793_p12)
}
 0x18d   : > { %s797_s9 = scalar_lea.hbm %s1181_s5, 16  ;;  %p1201_p4 = pmov %p1200_p3 }
 0x18e   : > { %p798_p2 = scmp.ne.s32.totalorder %s1181_s5, %s797_s9  ;;  %p803_p9 = scmp.lt.u32.totalorder %s797_s9, %s1181_s5 }
 0x190   : > { %p799_p6 = pnand %p798_p2, %p1201_p4 }
 0x192   : > { %p800_p8 = pneg %p799_p6 }
 0x194   : > { %p805_p11 = pnand %p803_p9, %p800_p8 }
 0x196   : > { %808 = shalt.err (!%p805_p11)
}
 0x197   : > { %p1202_p13 = pmov %p1200_p3 }
 0x199   : > { %605 = dma.vmem_to_hbm [thread:$0]  (%p1202_p13), %s1110_s12, 16, %s1181_s5, [#allocation9]  }
 0x19a   : > { %834 = dma.done.wait (%p1200_p3), [#allocation9], 32   ;;  %p1203_p7 = pmov %p1200_p3 }
 0x19c   : > { %836 = vsyncadd (%p1203_p7), [#allocation9], 4294967264 }
 0x19d PF: > { %s459_s24 = sand.u32 1, %s843_s18   ;;  %p1204_p10 = scmp.ne.s32.totalorder %s1186_s25, 0 }
 0x19e   : > { %p1205_p1 = scmp.ge.s32.totalorder %s855_s21, 2  ;;  %s460_s26 = scalar_lea.sflag [#allocation4], %s459_s24 }
 0x1a0   : > { %p620_p0 = pnand %p1205_p1, %p1204_p10 }
 0x1a2   : > { %838 = dma.done.wait (!%p620_p0), %s460_s26, 512  }
 0x1a3   : > { %840 = vsyncadd (!%p620_p0), %s460_s26, 4294966784  ;;  %p21_p5 = scmp.ge.s32.totalorder %s954_s30, 4   ;;  %s1206_s18 = smov %s847_s19 }
 0x1a4   : > { %s1207_s19 = smov %s851_s20  ;;  %s1208_s20 = smov %s988_s8 }
 0x1a5   : > { %s1209_s21 = smov %s954_s30  ;;  %23 = sbr.rel (!%p21_p5) target bundleno = 7 (0x7), region = 101 }
 0x1ac   :  { %465 = vsyncpa [#allocation3], 1 }
 0x1ad   :  { %467 = vsyncpa [#allocation3 + $0x1], 1 }
 0x1ae   :  { %468 = vsyncpa [#allocation6], 1 }
 0x1af   :  { %469 = vsyncpa [#allocation4], 1 }
 0x1b0   :  { %471 = vsyncpa [#allocation4 + $0x1], 1 }
 0x1b1   :  { %472 = vsyncpa [#allocation9], 1 }

</bundles_post_ra>
